<compile_context>
chip_gen: v6e
topology: v6e:2x2x1
jax: 0.10.0
libtpu: 0.0.40
codegen_flags: <defaults>
</compile_context>

<pallas_src>
import jax
import jax.numpy as jnp
from jax import lax
from jax.experimental import pallas as pl
from jax.experimental.pallas import tpu as pltpu


# ----------------------------- config ------------------------------------- #
class Cfg:
    num_frames = 3            # T
    num_boxes = 4             # MAX_N
    emb_features = 8          # D  (backbone feature channels)
    crop_size = (3, 3)        # K x K RoIAlign crop
    num_features_boxes = 32   # NFB
    num_features_relation = 32
    num_features_gcn = 32
    image_size = (32, 32)     # H, W
    out_size = (8, 8)         # OH, OW
    num_activities = 5        # A
    lite_dim = None           # -> in_dim = NFB (non-lite branch)
    train_dropout_prob = 0.3


CFG = Cfg()
EPS = 1e-5     # PyTorch LayerNorm default eps
APAD = 128     # lane-dense padded width of the activities output


# ------------------------- fused Pallas kernel ----------------------------- #
def fused_head(feat, wroi, w_emb_f, b_emb, g_emb, be_emb, g_dpi, be_dpi,
               w_act, b_act, *, B, T, N, KK, D, NFB):
    """Per batch element (grid=(B,), parallel):
    block-sparse RoIAlign dots -> one wide fc_emb_1 dot -> nl_emb_1 -> ReLU ->
    DPI residual -> dpi_nl -> ReLU -> max over persons -> fc_activities ->
    mean over frames.  Everything stays in VMEM/vregs."""
    OHW = feat.shape[2]
    KD = KK * D

    def kernel(feat_ref, wroi_ref, wemb_ref, bemb_ref, gemb_ref, beemb_ref,
               gdpi_ref, bdpi_ref, wact_ref, bact_ref, o_ref, rw_scr):
        f32 = jnp.float32

        # --- RoIAlign: one block-sparse bilinear-weight dot per frame (bf16 MXU),
        #     regrouped (kk, n, d) -> (n, kk*D + d) via a tiny VMEM scratch so the
        #     fc_emb contraction becomes a single 72-deep dot. ---
        for t in range(T):
            roi_t = jnp.dot(wroi_ref[0, t], feat_ref[0, t],
                            preferred_element_type=f32)           # (KK*N, D), rows (kk, n)
            for kk in range(KK):
                rw_scr[t * N:(t + 1) * N, kk * D:(kk + 1) * D] = \
                    roi_t[kk * N:(kk + 1) * N, :]
        roi_wide = rw_scr[...]                                     # (T*N, KK*D)

        # --- fc_emb_1: ONE wide dot, bias added once ---
        emb = jnp.dot(roi_wide, wemb_ref[...],
                      preferred_element_type=f32) + bemb_ref[...]  # (T*N, NFB)

        # --- nl_emb_1: LayerNorm over NFB per (t, n) row, then ReLU ---
        m = jnp.mean(emb, axis=-1, keepdims=True)
        v = jnp.mean((emb - m) ** 2, axis=-1, keepdims=True)
        emb = (emb - m) * lax.rsqrt(v + EPS) * gemb_ref[...] + beemb_ref[...]
        emb = jnp.maximum(emb, 0.0)

        # TODO(synk): Dynamic_Person_Inference source is not provided; it is
        # approximated as identity, so graph_boxes_features + boxes_features == 2*x.
        bs = emb + emb
        pieces = [bs[t * N:(t + 1) * N, :] for t in range(T)]      # (N, NFB) per frame

        # --- dpi_nl: LayerNorm over (T, NFB) per person ---
        rm = [jnp.mean(p, axis=-1, keepdims=True) for p in pieces]
        pm = rm[0]
        for r in rm[1:]:
            pm = pm + r
        pm = pm * (1.0 / T)                                        # (N, 1) per-person mean
        dev = [p - pm for p in pieces]
        rv = [jnp.mean(d * d, axis=-1, keepdims=True) for d in dev]
        pv = rv[0]
        for r in rv[1:]:
            pv = pv + r
        inv = lax.rsqrt(pv * (1.0 / T) + EPS)                      # (N, 1)

        # affine + ReLU (+ eval-mode dropout == identity), max over persons per
        # frame; fc_activities weights are pre-scaled by 1/T so the frame-sum of
        # pooled features gives the frame-mean of the scores.
        pooled = None
        for t in range(T):
            y = dev[t] * inv * gdpi_ref[t] + bdpi_ref[t]
            y = jnp.maximum(y, 0.0)
            fmax = jnp.max(y, axis=0, keepdims=True)               # (1, NFB)
            pooled = fmax if pooled is None else pooled + fmax
        scores = jnp.dot(pooled, wact_ref[...],
                         preferred_element_type=f32) + bact_ref[...]   # (1, APAD)
        o_ref[0] = jnp.broadcast_to(scores, (8, APAD))             # lane-dense full-tile store

    return pl.pallas_call(
        kernel,
        out_shape=jax.ShapeDtypeStruct((B, 8, APAD), jnp.float32),
        grid=(B,),
        in_specs=[
            pl.BlockSpec((1, T, OHW, D), lambda b: (b, 0, 0, 0)),       # feat (bf16)
            pl.BlockSpec((1, T, KK * N, OHW), lambda b: (b, 0, 0, 0)),  # wroi (bf16)
            pl.BlockSpec((KD, NFB), lambda b: (0, 0)),                  # fc_emb weight
            pl.BlockSpec((1, NFB), lambda b: (0, 0)),                   # fc_emb bias
            pl.BlockSpec((1, NFB), lambda b: (0, 0)),                   # nl_emb gamma
            pl.BlockSpec((1, NFB), lambda b: (0, 0)),                   # nl_emb beta
            pl.BlockSpec((T, 1, NFB), lambda b: (0, 0, 0)),             # dpi_nl gamma
            pl.BlockSpec((T, 1, NFB), lambda b: (0, 0, 0)),             # dpi_nl beta
            pl.BlockSpec((NFB, APAD), lambda b: (0, 0)),                # fc_activities / T
            pl.BlockSpec((1, APAD), lambda b: (0, 0)),                  # fc_activities bias
        ],
        out_specs=pl.BlockSpec((1, 8, APAD), lambda b: (b, 0, 0)),
        scratch_shapes=[pltpu.VMEM((T * N, KD), jnp.float32)],
        compiler_params=pltpu.CompilerParams(
            dimension_semantics=("parallel",)),
    )(feat, wroi, w_emb_f, b_emb, g_emb, be_emb, g_dpi, be_dpi, w_act, b_act)


# ------------------------------ plain-JAX glue ------------------------------ #
def backbone_features(images_in, w_bb, b_bb, out_size):
    # TODO(synk): pretrained Inception/VGG/ResNet backbone cannot be loaded here;
    # replaced by avg-pool to out_size + a 1x1 conv, folded into ONE channels-last
    # einsum (both are linear), so there is no extra kernel launch or transpose.
    B, T, C, H, W = images_in.shape
    OH, OW = out_size
    D = w_bb.shape[1]
    x = images_in.reshape(B * T, C, OH, H // OH, OW, W // OW)
    feats = jnp.einsum('bchpwq,cd->bhwd', x, w_bb) / ((H // OH) * (W // OW)) + b_bb
    return feats.reshape(B, T, OH * OW, D)          # (B, T, OHW, D), channels-last


def bilinear_roi_weights(boxes_in, B, T, N, K, OH, OW):
    """Block-sparse RoIAlign weights: (B, T, KK*N, OHW), rows ordered (ky, kx, n).

    roi[b, t, kk*N + n, d] = sum_pix W[b, t, kk*N+n, pix] * feat[b, t, pix, d].
    Built with broadcast arithmetic only (no gather / dynamic-slice ops).
    """
    # TODO(synk): exact torchvision RoIAlign sampling_ratio semantics are unknown;
    # one border-clamped bilinear sample per K x K bin center is used, and boxes
    # are consumed directly in (OH, OW) feature-map coordinates.
    f32 = jnp.float32
    x1, y1, x2, y2 = (boxes_in[..., 0], boxes_in[..., 1],
                      boxes_in[..., 2], boxes_in[..., 3])
    bins = (jnp.arange(K, dtype=f32) + 0.5) / K                        # (K,)
    ys = jnp.clip(y1[..., None] + bins * (y2 - y1)[..., None], 0.0, OH - 1.0)
    xs = jnp.clip(x1[..., None] + bins * (x2 - x1)[..., None], 0.0, OW - 1.0)
    wy = jnp.maximum(0.0, 1.0 - jnp.abs(ys[..., None] - jnp.arange(OH, dtype=f32)))
    wx = jnp.maximum(0.0, 1.0 - jnp.abs(xs[..., None] - jnp.arange(OW, dtype=f32)))
    w = wy[:, :, :, :, None, :, None] * wx[:, :, :, None, :, None, :]  # (B,T,N,Ky,Kx,OH,OW)
    w = jnp.transpose(w, (0, 1, 3, 4, 2, 5, 6))                        # (B,T,Ky,Kx,N,OH,OW)
    return w.reshape(B, T, K * K * N, OH * OW)


def dynamic_collective_forward(params, batch_data, cfg):
    images_in, boxes_in, bboxes_num_in = batch_data   # bboxes_num unused (reference uses N = MAX_N)
    B, T = images_in.shape[0], images_in.shape[1]
    OH, OW = cfg.out_size
    MAX_N = cfg.num_boxes
    K = cfg.crop_size[0]
    D = cfg.emb_features
    NFB = cfg.num_features_boxes
    A = cfg.num_activities
    KK = K * K

    # TODO(synk): prep_images() is not provided in the module source; identity used.
    feat = backbone_features(images_in, params['w_bb'], params['b_bb'], (OH, OW))
    wroi = bilinear_roi_weights(boxes_in, B, T, MAX_N, K, OH, OW)

    # bf16 operands for the RoI matmul (halves DMA bytes, MXU-native on v5e).
    feat = feat.astype(jnp.bfloat16)
    wroi = wroi.astype(jnp.bfloat16)

    # fc_emb_1: Linear(K*K*D, NFB) on torchvision roi_align's (C, Ky, Kx) flattening
    # -> permute to the kernel's (ky, kx, c) crop-lane ordering.
    w_emb_f = params['w_emb'].reshape(D, K, K, NFB).transpose(1, 2, 0, 3).reshape(KK * D, NFB)
    b_emb = params['b_emb'].reshape(1, NFB)
    g_emb = params['g_emb'].reshape(1, NFB)
    be_emb = params['be_emb'].reshape(1, NFB)
    g_dpi = params['g_dpi'].reshape(T, 1, NFB)
    be_dpi = params['be_dpi'].reshape(T, 1, NFB)
    w_act = jnp.zeros((NFB, APAD), jnp.float32).at[:, :A].set(params['w_act'] / T)
    b_act = jnp.zeros((1, APAD), jnp.float32).at[:, :A].set(params['b_act'])

    acts_pad = fused_head(
        feat, wroi, w_emb_f, b_emb, g_emb, be_emb, g_dpi, be_dpi, w_act, b_act,
        B=B, T=T, N=MAX_N, KK=KK, D=D, NFB=NFB)
    return {'activities': acts_pad[:, 0, :A]}


# --------------------------- parameter init --------------------------------- #
def init_params(key, cfg):
    D, K = cfg.emb_features, cfg.crop_size[0]
    NFB, T = cfg.num_features_boxes, cfg.num_frames
    in_dim = cfg.lite_dim if cfg.lite_dim else NFB
    A = cfg.num_activities
    k = jax.random.split(key, 3)

    def kaiming(kk, fan_in, shape):
        return jax.random.normal(kk, shape, jnp.float32) * jnp.sqrt(2.0 / fan_in)

    return {
        'w_bb': kaiming(k[0], 3, (3, D)),
        'b_bb': jnp.zeros((D,), jnp.float32),
        # stored transposed, input flattening order (c, ky, kx) like torchvision's crops
        'w_emb': kaiming(k[1], K * K * D, (D * K * K, NFB)),
        'b_emb': jnp.zeros((NFB,), jnp.float32),
        'g_emb': jnp.ones((NFB,), jnp.float32),
        'be_emb': jnp.zeros((NFB,), jnp.float32),
        'g_dpi': jnp.ones((T, in_dim), jnp.float32),
        'be_dpi': jnp.zeros((T, in_dim), jnp.float32),
        'w_act': kaiming(k[2], in_dim, (in_dim, A)),
        'b_act': jnp.zeros((A,), jnp.float32),
    }


# --------------------------------- main ------------------------------------ #
if __name__ == "__main__":
    cfg = CFG
    key = jax.random.PRNGKey(0)
    kimg, kbox, kpar = jax.random.split(key, 3)

    B, T, N = 2, cfg.num_frames, cfg.num_boxes
    H, W = cfg.image_size
    OH, OW = cfg.out_size

    images = jax.random.uniform(kimg, (B, T, 3, H, W), jnp.float32)

    # Boxes (x1, y1, x2, y2) in feature-map coordinates.
    k1, k2 = jax.random.split(kbox)
    tl = jax.random.uniform(k1, (B, T, N, 2), jnp.float32) * jnp.array([OW - 2.0, OH - 2.0])
    wh = 1.0 + jax.random.uniform(k2, (B, T, N, 2), jnp.float32) * jnp.array([OW / 2.0, OH / 2.0])
    br = jnp.minimum(tl + wh, jnp.array([OW - 1.0, OH - 1.0]))
    boxes = jnp.concatenate([tl[..., 0:1], tl[..., 1:2], br[..., 0:1], br[..., 1:2]], axis=-1)
    bboxes_num = jnp.full((B, T), N, jnp.int32)

    params = init_params(kpar, cfg)

    fwd = jax.jit(lambda p, imgs, bxs, nb: dynamic_collective_forward(p, (imgs, bxs, nb), cfg))
    out = fwd(params, images, boxes, bboxes_num)
    acts = jax.block_until_ready(out['activities'])
    assert acts.shape == (B, cfg.num_activities)
    assert bool(jnp.all(jnp.isfinite(acts)))
    print("KERNEL_OK")
</pallas_src>

<mosaic_0001>
module attributes {stable_mosaic.version = 11 : i64} {
  func.func @kernel(%arg0: i32, %arg1: memref<1x3x64x8xbf16, #tpu.memory_space<vmem>>, %arg2: memref<1x3x36x64xbf16, #tpu.memory_space<vmem>>, %arg3: memref<72x32xf32, #tpu.memory_space<vmem>>, %arg4: memref<1x32xf32, #tpu.memory_space<vmem>>, %arg5: memref<1x32xf32, #tpu.memory_space<vmem>>, %arg6: memref<1x32xf32, #tpu.memory_space<vmem>>, %arg7: memref<3x1x32xf32, #tpu.memory_space<vmem>>, %arg8: memref<3x1x32xf32, #tpu.memory_space<vmem>>, %arg9: memref<32x128xf32, #tpu.memory_space<vmem>>, %arg10: memref<1x128xf32, #tpu.memory_space<vmem>>, %arg11: memref<1x8x128xf32, #tpu.memory_space<vmem>>, %arg12: memref<12x72xf32, #tpu.memory_space<vmem>>) attributes {dimension_semantics = [#tpu.dimension_semantics<parallel>], iteration_bounds = array<i64: 2>, scalar_prefetch = 0 : i64, scratch_operands = 1 : i64, tpu.core_type = #tpu.core_type<tc>, window_params = [{transform_indices = @transform_0, window_bounds = array<i64: 1, 3, 64, 8>}, {transform_indices = @transform_1, window_bounds = array<i64: 1, 3, 36, 64>}, {pipeline_mode = #tpu.pipeline_mode<synchronous>, transform_indices = @transform_2, window_bounds = array<i64: 72, 32>}, {pipeline_mode = #tpu.pipeline_mode<synchronous>, transform_indices = @transform_3, window_bounds = array<i64: 1, 32>}, {pipeline_mode = #tpu.pipeline_mode<synchronous>, transform_indices = @transform_4, window_bounds = array<i64: 1, 32>}, {pipeline_mode = #tpu.pipeline_mode<synchronous>, transform_indices = @transform_5, window_bounds = array<i64: 1, 32>}, {pipeline_mode = #tpu.pipeline_mode<synchronous>, transform_indices = @transform_6, window_bounds = array<i64: 3, 1, 32>}, {pipeline_mode = #tpu.pipeline_mode<synchronous>, transform_indices = @transform_7, window_bounds = array<i64: 3, 1, 32>}, {pipeline_mode = #tpu.pipeline_mode<synchronous>, transform_indices = @transform_8, window_bounds = array<i64: 32, 128>}, {pipeline_mode = #tpu.pipeline_mode<synchronous>, transform_indices = @transform_9, window_bounds = array<i64: 1, 128>}, {transform_indices = @transform_10, window_bounds = array<i64: 1, 8, 128>}]} {
    %c0 = arith.constant 0 : index
    %c0_0 = arith.constant 0 : index
    %c0_1 = arith.constant 0 : index
    %c0_2 = arith.constant 0 : index
    %0 = vector.load %arg2[%c0, %c0_0, %c0_1, %c0_2] : memref<1x3x36x64xbf16, #tpu.memory_space<vmem>>, vector<1x1x36x64xbf16>
    %1 = vector.shape_cast %0 : vector<1x1x36x64xbf16> to vector<36x64xbf16>
    %c0_3 = arith.constant 0 : index
    %c0_4 = arith.constant 0 : index
    %c0_5 = arith.constant 0 : index
    %c0_6 = arith.constant 0 : index
    %2 = vector.load %arg1[%c0_3, %c0_4, %c0_5, %c0_6] : memref<1x3x64x8xbf16, #tpu.memory_space<vmem>>, vector<1x1x64x8xbf16>
    %3 = vector.shape_cast %2 : vector<1x1x64x8xbf16> to vector<64x8xbf16>
    %cst = arith.constant dense<0.000000e+00> : vector<36x8xf32>
    %4 = tpu.matmul %1, %3, %cst {dimension_numbers = #tpu.dot_dimension_numbers<[1], [0], [0], [1], [0, 0, 1, 1], [], []>} : vector<36x64xbf16>, vector<64x8xbf16>, vector<36x8xf32> -> vector<36x8xf32>
    %5 = vector.extract_strided_slice %4 {offsets = [0, 0], sizes = [4, 8], strides = [1, 1]} : vector<36x8xf32> to vector<4x8xf32>
    %c0_7 = arith.constant 0 : index
    %c0_8 = arith.constant 0 : index
    %6 = vector.load %arg12[%c0_7, %c0_8] : memref<12x72xf32, #tpu.memory_space<vmem>>, vector<4x8xf32>
    tpu.vector_store %arg12[%c0_7, %c0_8], %5 {strides = array<i32>} : memref<12x72xf32, #tpu.memory_space<vmem>>, vector<4x8xf32>,
    %7 = vector.extract_strided_slice %4 {offsets = [4, 0], sizes = [4, 8], strides = [1, 1]} : vector<36x8xf32> to vector<4x8xf32>
    %c0_9 = arith.constant 0 : index
    %c8 = arith.constant 8 : index
    %8 = vector.load %arg12[%c0_9, %c8] : memref<12x72xf32, #tpu.memory_space<vmem>>, vector<4x8xf32>
    tpu.vector_store %arg12[%c0_9, %c8], %7 {strides = array<i32>} : memref<12x72xf32, #tpu.memory_space<vmem>>, vector<4x8xf32>,
    %9 = vector.extract_strided_slice %4 {offsets = [8, 0], sizes = [4, 8], strides = [1, 1]} : vector<36x8xf32> to vector<4x8xf32>
    %c0_10 = arith.constant 0 : index
    %c16 = arith.constant 16 : index
    %10 = vector.load %arg12[%c0_10, %c16] : memref<12x72xf32, #tpu.memory_space<vmem>>, vector<4x8xf32>
    tpu.vector_store %arg12[%c0_10, %c16], %9 {strides = array<i32>} : memref<12x72xf32, #tpu.memory_space<vmem>>, vector<4x8xf32>,
    %11 = vector.extract_strided_slice %4 {offsets = [12, 0], sizes = [4, 8], strides = [1, 1]} : vector<36x8xf32> to vector<4x8xf32>
    %c0_11 = arith.constant 0 : index
    %c24 = arith.constant 24 : index
    %12 = vector.load %arg12[%c0_11, %c24] : memref<12x72xf32, #tpu.memory_space<vmem>>, vector<4x8xf32>
    tpu.vector_store %arg12[%c0_11, %c24], %11 {strides = array<i32>} : memref<12x72xf32, #tpu.memory_space<vmem>>, vector<4x8xf32>,
    %13 = vector.extract_strided_slice %4 {offsets = [16, 0], sizes = [4, 8], strides = [1, 1]} : vector<36x8xf32> to vector<4x8xf32>
    %c0_12 = arith.constant 0 : index
    %c32 = arith.constant 32 : index
    %14 = vector.load %arg12[%c0_12, %c32] : memref<12x72xf32, #tpu.memory_space<vmem>>, vector<4x8xf32>
    tpu.vector_store %arg12[%c0_12, %c32], %13 {strides = array<i32>} : memref<12x72xf32, #tpu.memory_space<vmem>>, vector<4x8xf32>,
    %15 = vector.extract_strided_slice %4 {offsets = [20, 0], sizes = [4, 8], strides = [1, 1]} : vector<36x8xf32> to vector<4x8xf32>
    %c0_13 = arith.constant 0 : index
    %c40 = arith.constant 40 : index
    %16 = vector.load %arg12[%c0_13, %c40] : memref<12x72xf32, #tpu.memory_space<vmem>>, vector<4x8xf32>
    tpu.vector_store %arg12[%c0_13, %c40], %15 {strides = array<i32>} : memref<12x72xf32, #tpu.memory_space<vmem>>, vector<4x8xf32>,
    %17 = vector.extract_strided_slice %4 {offsets = [24, 0], sizes = [4, 8], strides = [1, 1]} : vector<36x8xf32> to vector<4x8xf32>
    %c0_14 = arith.constant 0 : index
    %c48 = arith.constant 48 : index
    %18 = vector.load %arg12[%c0_14, %c48] : memref<12x72xf32, #tpu.memory_space<vmem>>, vector<4x8xf32>
    tpu.vector_store %arg12[%c0_14, %c48], %17 {strides = array<i32>} : memref<12x72xf32, #tpu.memory_space<vmem>>, vector<4x8xf32>,
    %19 = vector.extract_strided_slice %4 {offsets = [28, 0], sizes = [4, 8], strides = [1, 1]} : vector<36x8xf32> to vector<4x8xf32>
    %c0_15 = arith.constant 0 : index
    %c56 = arith.constant 56 : index
    %20 = vector.load %arg12[%c0_15, %c56] : memref<12x72xf32, #tpu.memory_space<vmem>>, vector<4x8xf32>
    tpu.vector_store %arg12[%c0_15, %c56], %19 {strides = array<i32>} : memref<12x72xf32, #tpu.memory_space<vmem>>, vector<4x8xf32>,
    %21 = vector.extract_strided_slice %4 {offsets = [32, 0], sizes = [4, 8], strides = [1, 1]} : vector<36x8xf32> to vector<4x8xf32>
    %c0_16 = arith.constant 0 : index
    %c64 = arith.constant 64 : index
    %22 = vector.load %arg12[%c0_16, %c64] : memref<12x72xf32, #tpu.memory_space<vmem>>, vector<4x8xf32>
    tpu.vector_store %arg12[%c0_16, %c64], %21 {strides = array<i32>} : memref<12x72xf32, #tpu.memory_space<vmem>>, vector<4x8xf32>,
    %c0_17 = arith.constant 0 : index
    %c1 = arith.constant 1 : index
    %c0_18 = arith.constant 0 : index
    %c0_19 = arith.constant 0 : index
    %23 = vector.load %arg2[%c0_17, %c1, %c0_18, %c0_19] : memref<1x3x36x64xbf16, #tpu.memory_space<vmem>>, vector<1x1x36x64xbf16>
    %24 = vector.shape_cast %23 : vector<1x1x36x64xbf16> to vector<36x64xbf16>
    %c0_20 = arith.constant 0 : index
    %c1_21 = arith.constant 1 : index
    %c0_22 = arith.constant 0 : index
    %c0_23 = arith.constant 0 : index
    %25 = vector.load %arg1[%c0_20, %c1_21, %c0_22, %c0_23] : memref<1x3x64x8xbf16, #tpu.memory_space<vmem>>, vector<1x1x64x8xbf16>
    %26 = vector.shape_cast %25 : vector<1x1x64x8xbf16> to vector<64x8xbf16>
    %cst_24 = arith.constant dense<0.000000e+00> : vector<36x8xf32>
    %27 = tpu.matmul %24, %26, %cst_24 {dimension_numbers = #tpu.dot_dimension_numbers<[1], [0], [0], [1], [0, 0, 1, 1], [], []>} : vector<36x64xbf16>, vector<64x8xbf16>, vector<36x8xf32> -> vector<36x8xf32>
    %28 = vector.extract_strided_slice %27 {offsets = [0, 0], sizes = [4, 8], strides = [1, 1]} : vector<36x8xf32> to vector<4x8xf32>
    %c4 = arith.constant 4 : index
    %c0_25 = arith.constant 0 : index
    %29 = vector.load %arg12[%c4, %c0_25] : memref<12x72xf32, #tpu.memory_space<vmem>>, vector<4x8xf32>
    tpu.vector_store %arg12[%c4, %c0_25], %28 {strides = array<i32>} : memref<12x72xf32, #tpu.memory_space<vmem>>, vector<4x8xf32>,
    %30 = vector.extract_strided_slice %27 {offsets = [4, 0], sizes = [4, 8], strides = [1, 1]} : vector<36x8xf32> to vector<4x8xf32>
    %c4_26 = arith.constant 4 : index
    %c8_27 = arith.constant 8 : index
    %31 = vector.load %arg12[%c4_26, %c8_27] : memref<12x72xf32, #tpu.memory_space<vmem>>, vector<4x8xf32>
    tpu.vector_store %arg12[%c4_26, %c8_27], %30 {strides = array<i32>} : memref<12x72xf32, #tpu.memory_space<vmem>>, vector<4x8xf32>,
    %32 = vector.extract_strided_slice %27 {offsets = [8, 0], sizes = [4, 8], strides = [1, 1]} : vector<36x8xf32> to vector<4x8xf32>
    %c4_28 = arith.constant 4 : index
    %c16_29 = arith.constant 16 : index
    %33 = vector.load %arg12[%c4_28, %c16_29] : memref<12x72xf32, #tpu.memory_space<vmem>>, vector<4x8xf32>
    tpu.vector_store %arg12[%c4_28, %c16_29], %32 {strides = array<i32>} : memref<12x72xf32, #tpu.memory_space<vmem>>, vector<4x8xf32>,
    %34 = vector.extract_strided_slice %27 {offsets = [12, 0], sizes = [4, 8], strides = [1, 1]} : vector<36x8xf32> to vector<4x8xf32>
    %c4_30 = arith.constant 4 : index
    %c24_31 = arith.constant 24 : index
    %35 = vector.load %arg12[%c4_30, %c24_31] : memref<12x72xf32, #tpu.memory_space<vmem>>, vector<4x8xf32>
    tpu.vector_store %arg12[%c4_30, %c24_31], %34 {strides = array<i32>} : memref<12x72xf32, #tpu.memory_space<vmem>>, vector<4x8xf32>,
    %36 = vector.extract_strided_slice %27 {offsets = [16, 0], sizes = [4, 8], strides = [1, 1]} : vector<36x8xf32> to vector<4x8xf32>
    %c4_32 = arith.constant 4 : index
    %c32_33 = arith.constant 32 : index
    %37 = vector.load %arg12[%c4_32, %c32_33] : memref<12x72xf32, #tpu.memory_space<vmem>>, vector<4x8xf32>
    tpu.vector_store %arg12[%c4_32, %c32_33], %36 {strides = array<i32>} : memref<12x72xf32, #tpu.memory_space<vmem>>, vector<4x8xf32>,
    %38 = vector.extract_strided_slice %27 {offsets = [20, 0], sizes = [4, 8], strides = [1, 1]} : vector<36x8xf32> to vector<4x8xf32>
    %c4_34 = arith.constant 4 : index
    %c40_35 = arith.constant 40 : index
    %39 = vector.load %arg12[%c4_34, %c40_35] : memref<12x72xf32, #tpu.memory_space<vmem>>, vector<4x8xf32>
    tpu.vector_store %arg12[%c4_34, %c40_35], %38 {strides = array<i32>} : memref<12x72xf32, #tpu.memory_space<vmem>>, vector<4x8xf32>,
    %40 = vector.extract_strided_slice %27 {offsets = [24, 0], sizes = [4, 8], strides = [1, 1]} : vector<36x8xf32> to vector<4x8xf32>
    %c4_36 = arith.constant 4 : index
    %c48_37 = arith.constant 48 : index
    %41 = vector.load %arg12[%c4_36, %c48_37] : memref<12x72xf32, #tpu.memory_space<vmem>>, vector<4x8xf32>
    tpu.vector_store %arg12[%c4_36, %c48_37], %40 {strides = array<i32>} : memref<12x72xf32, #tpu.memory_space<vmem>>, vector<4x8xf32>,
    %42 = vector.extract_strided_slice %27 {offsets = [28, 0], sizes = [4, 8], strides = [1, 1]} : vector<36x8xf32> to vector<4x8xf32>
    %c4_38 = arith.constant 4 : index
    %c56_39 = arith.constant 56 : index
    %43 = vector.load %arg12[%c4_38, %c56_39] : memref<12x72xf32, #tpu.memory_space<vmem>>, vector<4x8xf32>
    tpu.vector_store %arg12[%c4_38, %c56_39], %42 {strides = array<i32>} : memref<12x72xf32, #tpu.memory_space<vmem>>, vector<4x8xf32>,
    %44 = vector.extract_strided_slice %27 {offsets = [32, 0], sizes = [4, 8], strides = [1, 1]} : vector<36x8xf32> to vector<4x8xf32>
    %c4_40 = arith.constant 4 : index
    %c64_41 = arith.constant 64 : index
    %45 = vector.load %arg12[%c4_40, %c64_41] : memref<12x72xf32, #tpu.memory_space<vmem>>, vector<4x8xf32>
    tpu.vector_store %arg12[%c4_40, %c64_41], %44 {strides = array<i32>} : memref<12x72xf32, #tpu.memory_space<vmem>>, vector<4x8xf32>,
    %c0_42 = arith.constant 0 : index
    %c2 = arith.constant 2 : index
    %c0_43 = arith.constant 0 : index
    %c0_44 = arith.constant 0 : index
    %46 = vector.load %arg2[%c0_42, %c2, %c0_43, %c0_44] : memref<1x3x36x64xbf16, #tpu.memory_space<vmem>>, vector<1x1x36x64xbf16>
    %47 = vector.shape_cast %46 : vector<1x1x36x64xbf16> to vector<36x64xbf16>
    %c0_45 = arith.constant 0 : index
    %c2_46 = arith.constant 2 : index
    %c0_47 = arith.constant 0 : index
    %c0_48 = arith.constant 0 : index
    %48 = vector.load %arg1[%c0_45, %c2_46, %c0_47, %c0_48] : memref<1x3x64x8xbf16, #tpu.memory_space<vmem>>, vector<1x1x64x8xbf16>
    %49 = vector.shape_cast %48 : vector<1x1x64x8xbf16> to vector<64x8xbf16>
    %cst_49 = arith.constant dense<0.000000e+00> : vector<36x8xf32>
    %50 = tpu.matmul %47, %49, %cst_49 {dimension_numbers = #tpu.dot_dimension_numbers<[1], [0], [0], [1], [0, 0, 1, 1], [], []>} : vector<36x64xbf16>, vector<64x8xbf16>, vector<36x8xf32> -> vector<36x8xf32>
    %51 = vector.extract_strided_slice %50 {offsets = [0, 0], sizes = [4, 8], strides = [1, 1]} : vector<36x8xf32> to vector<4x8xf32>
    %c8_50 = arith.constant 8 : index
    %c0_51 = arith.constant 0 : index
    %52 = vector.load %arg12[%c8_50, %c0_51] : memref<12x72xf32, #tpu.memory_space<vmem>>, vector<4x8xf32>
    tpu.vector_store %arg12[%c8_50, %c0_51], %51 {strides = array<i32>} : memref<12x72xf32, #tpu.memory_space<vmem>>, vector<4x8xf32>,
    %53 = vector.extract_strided_slice %50 {offsets = [4, 0], sizes = [4, 8], strides = [1, 1]} : vector<36x8xf32> to vector<4x8xf32>
    %c8_52 = arith.constant 8 : index
    %c8_53 = arith.constant 8 : index
    %54 = vector.load %arg12[%c8_52, %c8_53] : memref<12x72xf32, #tpu.memory_space<vmem>>, vector<4x8xf32>
    tpu.vector_store %arg12[%c8_52, %c8_53], %53 {strides = array<i32>} : memref<12x72xf32, #tpu.memory_space<vmem>>, vector<4x8xf32>,
    %55 = vector.extract_strided_slice %50 {offsets = [8, 0], sizes = [4, 8], strides = [1, 1]} : vector<36x8xf32> to vector<4x8xf32>
    %c8_54 = arith.constant 8 : index
    %c16_55 = arith.constant 16 : index
    %56 = vector.load %arg12[%c8_54, %c16_55] : memref<12x72xf32, #tpu.memory_space<vmem>>, vector<4x8xf32>
    tpu.vector_store %arg12[%c8_54, %c16_55], %55 {strides = array<i32>} : memref<12x72xf32, #tpu.memory_space<vmem>>, vector<4x8xf32>,
    %57 = vector.extract_strided_slice %50 {offsets = [12, 0], sizes = [4, 8], strides = [1, 1]} : vector<36x8xf32> to vector<4x8xf32>
    %c8_56 = arith.constant 8 : index
    %c24_57 = arith.constant 24 : index
    %58 = vector.load %arg12[%c8_56, %c24_57] : memref<12x72xf32, #tpu.memory_space<vmem>>, vector<4x8xf32>
    tpu.vector_store %arg12[%c8_56, %c24_57], %57 {strides = array<i32>} : memref<12x72xf32, #tpu.memory_space<vmem>>, vector<4x8xf32>,
    %59 = vector.extract_strided_slice %50 {offsets = [16, 0], sizes = [4, 8], strides = [1, 1]} : vector<36x8xf32> to vector<4x8xf32>
    %c8_58 = arith.constant 8 : index
    %c32_59 = arith.constant 32 : index
    %60 = vector.load %arg12[%c8_58, %c32_59] : memref<12x72xf32, #tpu.memory_space<vmem>>, vector<4x8xf32>
    tpu.vector_store %arg12[%c8_58, %c32_59], %59 {strides = array<i32>} : memref<12x72xf32, #tpu.memory_space<vmem>>, vector<4x8xf32>,
    %61 = vector.extract_strided_slice %50 {offsets = [20, 0], sizes = [4, 8], strides = [1, 1]} : vector<36x8xf32> to vector<4x8xf32>
    %c8_60 = arith.constant 8 : index
    %c40_61 = arith.constant 40 : index
    %62 = vector.load %arg12[%c8_60, %c40_61] : memref<12x72xf32, #tpu.memory_space<vmem>>, vector<4x8xf32>
    tpu.vector_store %arg12[%c8_60, %c40_61], %61 {strides = array<i32>} : memref<12x72xf32, #tpu.memory_space<vmem>>, vector<4x8xf32>,
    %63 = vector.extract_strided_slice %50 {offsets = [24, 0], sizes = [4, 8], strides = [1, 1]} : vector<36x8xf32> to vector<4x8xf32>
    %c8_62 = arith.constant 8 : index
    %c48_63 = arith.constant 48 : index
    %64 = vector.load %arg12[%c8_62, %c48_63] : memref<12x72xf32, #tpu.memory_space<vmem>>, vector<4x8xf32>
    tpu.vector_store %arg12[%c8_62, %c48_63], %63 {strides = array<i32>} : memref<12x72xf32, #tpu.memory_space<vmem>>, vector<4x8xf32>,
    %65 = vector.extract_strided_slice %50 {offsets = [28, 0], sizes = [4, 8], strides = [1, 1]} : vector<36x8xf32> to vector<4x8xf32>
    %c8_64 = arith.constant 8 : index
    %c56_65 = arith.constant 56 : index
    %66 = vector.load %arg12[%c8_64, %c56_65] : memref<12x72xf32, #tpu.memory_space<vmem>>, vector<4x8xf32>
    tpu.vector_store %arg12[%c8_64, %c56_65], %65 {strides = array<i32>} : memref<12x72xf32, #tpu.memory_space<vmem>>, vector<4x8xf32>,
    %67 = vector.extract_strided_slice %50 {offsets = [32, 0], sizes = [4, 8], strides = [1, 1]} : vector<36x8xf32> to vector<4x8xf32>
    %c8_66 = arith.constant 8 : index
    %c64_67 = arith.constant 64 : index
    %68 = vector.load %arg12[%c8_66, %c64_67] : memref<12x72xf32, #tpu.memory_space<vmem>>, vector<4x8xf32>
    tpu.vector_store %arg12[%c8_66, %c64_67], %67 {strides = array<i32>} : memref<12x72xf32, #tpu.memory_space<vmem>>, vector<4x8xf32>,
    %c0_68 = arith.constant 0 : index
    %c0_69 = arith.constant 0 : index
    %69 = vector.load %arg12[%c0_68, %c0_69] : memref<12x72xf32, #tpu.memory_space<vmem>>, vector<12x72xf32>
    %c0_70 = arith.constant 0 : index
    %c0_71 = arith.constant 0 : index
    %70 = vector.load %arg3[%c0_70, %c0_71] : memref<72x32xf32, #tpu.memory_space<vmem>>, vector<72x32xf32>
    %cst_72 = arith.constant dense<0.000000e+00> : vector<12x32xf32>
    %71 = tpu.matmul %69, %70, %cst_72 {dimension_numbers = #tpu.dot_dimension_numbers<[1], [0], [0], [1], [0, 0, 1, 1], [], []>} : vector<12x72xf32>, vector<72x32xf32>, vector<12x32xf32> -> vector<12x32xf32>
    %c0_73 = arith.constant 0 : index
    %c0_74 = arith.constant 0 : index
    %72 = vector.load %arg4[%c0_73, %c0_74] : memref<1x32xf32, #tpu.memory_space<vmem>>, vector<1x32xf32>
    %73 = vector.broadcast %72 : vector<1x32xf32> to vector<12x32xf32>
    %74 = arith.addf %71, %73 : vector<12x32xf32>
    %cst_75 = arith.constant dense<0.000000e+00> : vector<12xf32>
    %75 = vector.multi_reduction <add>, %74, %cst_75 [1] : vector<12x32xf32> to vector<12xf32>
    %76 = vector.shape_cast %75 : vector<12xf32> to vector<12x1xf32>
    %cst_76 = arith.constant 3.200000e+01 : f32
    %77 = vector.broadcast %cst_76 : f32 to vector<12x1xf32>
    %78 = arith.divf %76, %77 : vector<12x1xf32>
    %79 = vector.broadcast %78 : vector<12x1xf32> to vector<12x32xf32>
    %80 = arith.subf %74, %79 : vector<12x32xf32>
    %81 = arith.mulf %80, %80 : vector<12x32xf32>
    %cst_77 = arith.constant dense<0.000000e+00> : vector<12xf32>
    %82 = vector.multi_reduction <add>, %81, %cst_77 [1] : vector<12x32xf32> to vector<12xf32>
    %83 = vector.shape_cast %82 : vector<12xf32> to vector<12x1xf32>
    %cst_78 = arith.constant 3.200000e+01 : f32
    %84 = vector.broadcast %cst_78 : f32 to vector<12x1xf32>
    %85 = arith.divf %83, %84 : vector<12x1xf32>
    %86 = vector.broadcast %78 : vector<12x1xf32> to vector<12x32xf32>
    %87 = arith.subf %74, %86 : vector<12x32xf32>
    %cst_79 = arith.constant 9.99999974E-6 : f32
    %88 = vector.broadcast %cst_79 : f32 to vector<12x1xf32>
    %89 = arith.addf %85, %88 : vector<12x1xf32>
    %90 = math.rsqrt %89 : vector<12x1xf32>
    %91 = vector.broadcast %90 : vector<12x1xf32> to vector<12x32xf32>
    %92 = arith.mulf %87, %91 : vector<12x32xf32>
    %c0_80 = arith.constant 0 : index
    %c0_81 = arith.constant 0 : index
    %93 = vector.load %arg5[%c0_80, %c0_81] : memref<1x32xf32, #tpu.memory_space<vmem>>, vector<1x32xf32>
    %94 = vector.broadcast %93 : vector<1x32xf32> to vector<12x32xf32>
    %95 = arith.mulf %92, %94 : vector<12x32xf32>
    %c0_82 = arith.constant 0 : index
    %c0_83 = arith.constant 0 : index
    %96 = vector.load %arg6[%c0_82, %c0_83] : memref<1x32xf32, #tpu.memory_space<vmem>>, vector<1x32xf32>
    %97 = vector.broadcast %96 : vector<1x32xf32> to vector<12x32xf32>
    %98 = arith.addf %95, %97 : vector<12x32xf32>
    %cst_84 = arith.constant 0.000000e+00 : f32
    %99 = vector.broadcast %cst_84 : f32 to vector<12x32xf32>
    %100 = arith.maximumf %98, %99 : vector<12x32xf32>
    %101 = arith.addf %100, %100 : vector<12x32xf32>
    %102 = vector.extract_strided_slice %101 {offsets = [0, 0], sizes = [4, 32], strides = [1, 1]} : vector<12x32xf32> to vector<4x32xf32>
    %103 = vector.extract_strided_slice %101 {offsets = [4, 0], sizes = [4, 32], strides = [1, 1]} : vector<12x32xf32> to vector<4x32xf32>
    %104 = vector.extract_strided_slice %101 {offsets = [8, 0], sizes = [4, 32], strides = [1, 1]} : vector<12x32xf32> to vector<4x32xf32>
    %cst_85 = arith.constant dense<0.000000e+00> : vector<4xf32>
    %105 = vector.multi_reduction <add>, %102, %cst_85 [1] : vector<4x32xf32> to vector<4xf32>
    %106 = vector.shape_cast %105 : vector<4xf32> to vector<4x1xf32>
    %cst_86 = arith.constant 3.200000e+01 : f32
    %107 = vector.broadcast %cst_86 : f32 to vector<4x1xf32>
    %108 = arith.divf %106, %107 : vector<4x1xf32>
    %cst_87 = arith.constant dense<0.000000e+00> : vector<4xf32>
    %109 = vector.multi_reduction <add>, %103, %cst_87 [1] : vector<4x32xf32> to vector<4xf32>
    %110 = vector.shape_cast %109 : vector<4xf32> to vector<4x1xf32>
    %cst_88 = arith.constant 3.200000e+01 : f32
    %111 = vector.broadcast %cst_88 : f32 to vector<4x1xf32>
    %112 = arith.divf %110, %111 : vector<4x1xf32>
    %cst_89 = arith.constant dense<0.000000e+00> : vector<4xf32>
    %113 = vector.multi_reduction <add>, %104, %cst_89 [1] : vector<4x32xf32> to vector<4xf32>
    %114 = vector.shape_cast %113 : vector<4xf32> to vector<4x1xf32>
    %cst_90 = arith.constant 3.200000e+01 : f32
    %115 = vector.broadcast %cst_90 : f32 to vector<4x1xf32>
    %116 = arith.divf %114, %115 : vector<4x1xf32>
    %117 = arith.addf %108, %112 : vector<4x1xf32>
    %118 = arith.addf %117, %116 : vector<4x1xf32>
    %cst_91 = arith.constant 0.333333343 : f32
    %119 = vector.broadcast %cst_91 : f32 to vector<4x1xf32>
    %120 = arith.mulf %118, %119 : vector<4x1xf32>
    %121 = vector.broadcast %120 : vector<4x1xf32> to vector<4x32xf32>
    %122 = arith.subf %102, %121 : vector<4x32xf32>
    %123 = vector.broadcast %120 : vector<4x1xf32> to vector<4x32xf32>
    %124 = arith.subf %103, %123 : vector<4x32xf32>
    %125 = vector.broadcast %120 : vector<4x1xf32> to vector<4x32xf32>
    %126 = arith.subf %104, %125 : vector<4x32xf32>
    %127 = arith.mulf %122, %122 : vector<4x32xf32>
    %cst_92 = arith.constant dense<0.000000e+00> : vector<4xf32>
    %128 = vector.multi_reduction <add>, %127, %cst_92 [1] : vector<4x32xf32> to vector<4xf32>
    %129 = vector.shape_cast %128 : vector<4xf32> to vector<4x1xf32>
    %cst_93 = arith.constant 3.200000e+01 : f32
    %130 = vector.broadcast %cst_93 : f32 to vector<4x1xf32>
    %131 = arith.divf %129, %130 : vector<4x1xf32>
    %132 = arith.mulf %124, %124 : vector<4x32xf32>
    %cst_94 = arith.constant dense<0.000000e+00> : vector<4xf32>
    %133 = vector.multi_reduction <add>, %132, %cst_94 [1] : vector<4x32xf32> to vector<4xf32>
    %134 = vector.shape_cast %133 : vector<4xf32> to vector<4x1xf32>
    %cst_95 = arith.constant 3.200000e+01 : f32
    %135 = vector.broadcast %cst_95 : f32 to vector<4x1xf32>
    %136 = arith.divf %134, %135 : vector<4x1xf32>
    %137 = arith.mulf %126, %126 : vector<4x32xf32>
    %cst_96 = arith.constant dense<0.000000e+00> : vector<4xf32>
    %138 = vector.multi_reduction <add>, %137, %cst_96 [1] : vector<4x32xf32> to vector<4xf32>
    %139 = vector.shape_cast %138 : vector<4xf32> to vector<4x1xf32>
    %cst_97 = arith.constant 3.200000e+01 : f32
    %140 = vector.broadcast %cst_97 : f32 to vector<4x1xf32>
    %141 = arith.divf %139, %140 : vector<4x1xf32>
    %142 = arith.addf %131, %136 : vector<4x1xf32>
    %143 = arith.addf %142, %141 : vector<4x1xf32>
    %cst_98 = arith.constant 0.333333343 : f32
    %144 = vector.broadcast %cst_98 : f32 to vector<4x1xf32>
    %145 = arith.mulf %143, %144 : vector<4x1xf32>
    %cst_99 = arith.constant 9.99999974E-6 : f32
    %146 = vector.broadcast %cst_99 : f32 to vector<4x1xf32>
    %147 = arith.addf %145, %146 : vector<4x1xf32>
    %148 = math.rsqrt %147 : vector<4x1xf32>
    %149 = vector.broadcast %148 : vector<4x1xf32> to vector<4x32xf32>
    %150 = arith.mulf %122, %149 : vector<4x32xf32>
    %c0_100 = arith.constant 0 : index
    %c0_101 = arith.constant 0 : index
    %c0_102 = arith.constant 0 : index
    %151 = vector.load %arg7[%c0_100, %c0_101, %c0_102] : memref<3x1x32xf32, #tpu.memory_space<vmem>>, vector<1x1x32xf32>
    %152 = vector.shape_cast %151 : vector<1x1x32xf32> to vector<1x32xf32>
    %153 = vector.broadcast %152 : vector<1x32xf32> to vector<4x32xf32>
    %154 = arith.mulf %150, %153 : vector<4x32xf32>
    %c0_103 = arith.constant 0 : index
    %c0_104 = arith.constant 0 : index
    %c0_105 = arith.constant 0 : index
    %155 = vector.load %arg8[%c0_103, %c0_104, %c0_105] : memref<3x1x32xf32, #tpu.memory_space<vmem>>, vector<1x1x32xf32>
    %156 = vector.shape_cast %155 : vector<1x1x32xf32> to vector<1x32xf32>
    %157 = vector.broadcast %156 : vector<1x32xf32> to vector<4x32xf32>
    %158 = arith.addf %154, %157 : vector<4x32xf32>
    %cst_106 = arith.constant 0.000000e+00 : f32
    %159 = vector.broadcast %cst_106 : f32 to vector<4x32xf32>
    %160 = arith.maximumf %158, %159 : vector<4x32xf32>
    %cst_107 = arith.constant dense<0xFF800000> : vector<32xf32>
    %161 = vector.multi_reduction <maximumf>, %160, %cst_107 [0] : vector<4x32xf32> to vector<32xf32>
    %162 = vector.shape_cast %161 : vector<32xf32> to vector<1x32xf32>
    %163 = vector.broadcast %148 : vector<4x1xf32> to vector<4x32xf32>
    %164 = arith.mulf %124, %163 : vector<4x32xf32>
    %c1_108 = arith.constant 1 : index
    %c0_109 = arith.constant 0 : index
    %c0_110 = arith.constant 0 : index
    %165 = vector.load %arg7[%c1_108, %c0_109, %c0_110] : memref<3x1x32xf32, #tpu.memory_space<vmem>>, vector<1x1x32xf32>
    %166 = vector.shape_cast %165 : vector<1x1x32xf32> to vector<1x32xf32>
    %167 = vector.broadcast %166 : vector<1x32xf32> to vector<4x32xf32>
    %168 = arith.mulf %164, %167 : vector<4x32xf32>
    %c1_111 = arith.constant 1 : index
    %c0_112 = arith.constant 0 : index
    %c0_113 = arith.constant 0 : index
    %169 = vector.load %arg8[%c1_111, %c0_112, %c0_113] : memref<3x1x32xf32, #tpu.memory_space<vmem>>, vector<1x1x32xf32>
    %170 = vector.shape_cast %169 : vector<1x1x32xf32> to vector<1x32xf32>
    %171 = vector.broadcast %170 : vector<1x32xf32> to vector<4x32xf32>
    %172 = arith.addf %168, %171 : vector<4x32xf32>
    %cst_114 = arith.constant 0.000000e+00 : f32
    %173 = vector.broadcast %cst_114 : f32 to vector<4x32xf32>
    %174 = arith.maximumf %172, %173 : vector<4x32xf32>
    %cst_115 = arith.constant dense<0xFF800000> : vector<32xf32>
    %175 = vector.multi_reduction <maximumf>, %174, %cst_115 [0] : vector<4x32xf32> to vector<32xf32>
    %176 = vector.shape_cast %175 : vector<32xf32> to vector<1x32xf32>
    %177 = arith.addf %162, %176 : vector<1x32xf32>
    %178 = vector.broadcast %148 : vector<4x1xf32> to vector<4x32xf32>
    %179 = arith.mulf %126, %178 : vector<4x32xf32>
    %c2_116 = arith.constant 2 : index
    %c0_117 = arith.constant 0 : index
    %c0_118 = arith.constant 0 : index
    %180 = vector.load %arg7[%c2_116, %c0_117, %c0_118] : memref<3x1x32xf32, #tpu.memory_space<vmem>>, vector<1x1x32xf32>
    %181 = vector.shape_cast %180 : vector<1x1x32xf32> to vector<1x32xf32>
    %182 = vector.broadcast %181 : vector<1x32xf32> to vector<4x32xf32>
    %183 = arith.mulf %179, %182 : vector<4x32xf32>
    %c2_119 = arith.constant 2 : index
    %c0_120 = arith.constant 0 : index
    %c0_121 = arith.constant 0 : index
    %184 = vector.load %arg8[%c2_119, %c0_120, %c0_121] : memref<3x1x32xf32, #tpu.memory_space<vmem>>, vector<1x1x32xf32>
    %185 = vector.shape_cast %184 : vector<1x1x32xf32> to vector<1x32xf32>
    %186 = vector.broadcast %185 : vector<1x32xf32> to vector<4x32xf32>
    %187 = arith.addf %183, %186 : vector<4x32xf32>
    %cst_122 = arith.constant 0.000000e+00 : f32
    %188 = vector.broadcast %cst_122 : f32 to vector<4x32xf32>
    %189 = arith.maximumf %187, %188 : vector<4x32xf32>
    %cst_123 = arith.constant dense<0xFF800000> : vector<32xf32>
    %190 = vector.multi_reduction <maximumf>, %189, %cst_123 [0] : vector<4x32xf32> to vector<32xf32>
    %191 = vector.shape_cast %190 : vector<32xf32> to vector<1x32xf32>
    %192 = arith.addf %177, %191 : vector<1x32xf32>
    %c0_124 = arith.constant 0 : index
    %c0_125 = arith.constant 0 : index
    %193 = vector.load %arg9[%c0_124, %c0_125] : memref<32x128xf32, #tpu.memory_space<vmem>>, vector<32x128xf32>
    %cst_126 = arith.constant dense<0.000000e+00> : vector<1x128xf32>
    %194 = tpu.matmul %192, %193, %cst_126 {dimension_numbers = #tpu.dot_dimension_numbers<[1], [0], [0], [1], [0, 0, 1, 1], [], []>} : vector<1x32xf32>, vector<32x128xf32>, vector<1x128xf32> -> vector<1x128xf32>
    %c0_127 = arith.constant 0 : index
    %c0_128 = arith.constant 0 : index
    %195 = vector.load %arg10[%c0_127, %c0_128] : memref<1x128xf32, #tpu.memory_space<vmem>>, vector<1x128xf32>
    %196 = arith.addf %194, %195 : vector<1x128xf32>
    %197 = vector.shape_cast %196 : vector<1x128xf32> to vector<1x128xf32>
    %198 = vector.broadcast %197 : vector<1x128xf32> to vector<8x128xf32>
    %c0_129 = arith.constant 0 : index
    %c0_130 = arith.constant 0 : index
    %c0_131 = arith.constant 0 : index
    %199 = vector.load %arg11[%c0_129, %c0_130, %c0_131] : memref<1x8x128xf32, #tpu.memory_space<vmem>>, vector<1x8x128xf32>
    %200 = vector.shape_cast %199 : vector<1x8x128xf32> to vector<8x128xf32>
    %201 = vector.shape_cast %198 : vector<8x128xf32> to vector<1x8x128xf32>
    tpu.vector_store %arg11[%c0_129, %c0_130, %c0_131], %201 {strides = array<i32>} : memref<1x8x128xf32, #tpu.memory_space<vmem>>, vector<1x8x128xf32>,
    return
  }
  func.func @transform_0(%arg0: i32) -> (i32, i32, i32, i32) {
    %c0_i32 = arith.constant 0 : i32
    %c0_i32_0 = arith.constant 0 : i32
    %c0_i32_1 = arith.constant 0 : i32
    %c0_i32_2 = arith.constant 0 : i32
    return %arg0, %c0_i32, %c0_i32_0, %c0_i32_1 : i32, i32, i32, i32
  }
  func.func @transform_1(%arg0: i32) -> (i32, i32, i32, i32) {
    %c0_i32 = arith.constant 0 : i32
    %c0_i32_0 = arith.constant 0 : i32
    %c0_i32_1 = arith.constant 0 : i32
    %c0_i32_2 = arith.constant 0 : i32
    return %arg0, %c0_i32, %c0_i32_0, %c0_i32_1 : i32, i32, i32, i32
  }
  func.func @transform_2(%arg0: i32) -> (i32, i32) {
    %c0_i32 = arith.constant 0 : i32
    %c0_i32_0 = arith.constant 0 : i32
    %c0_i32_1 = arith.constant 0 : i32
    return %c0_i32, %c0_i32_0 : i32, i32
  }
  func.func @transform_3(%arg0: i32) -> (i32, i32) {
    %c0_i32 = arith.constant 0 : i32
    %c0_i32_0 = arith.constant 0 : i32
    %c0_i32_1 = arith.constant 0 : i32
    return %c0_i32, %c0_i32_0 : i32, i32
  }
  func.func @transform_4(%arg0: i32) -> (i32, i32) {
    %c0_i32 = arith.constant 0 : i32
    %c0_i32_0 = arith.constant 0 : i32
    %c0_i32_1 = arith.constant 0 : i32
    return %c0_i32, %c0_i32_0 : i32, i32
  }
  func.func @transform_5(%arg0: i32) -> (i32, i32) {
    %c0_i32 = arith.constant 0 : i32
    %c0_i32_0 = arith.constant 0 : i32
    %c0_i32_1 = arith.constant 0 : i32
    return %c0_i32, %c0_i32_0 : i32, i32
  }
  func.func @transform_6(%arg0: i32) -> (i32, i32, i32) {
    %c0_i32 = arith.constant 0 : i32
    %c0_i32_0 = arith.constant 0 : i32
    %c0_i32_1 = arith.constant 0 : i32
    %c0_i32_2 = arith.constant 0 : i32
    return %c0_i32, %c0_i32_0, %c0_i32_1 : i32, i32, i32
  }
  func.func @transform_7(%arg0: i32) -> (i32, i32, i32) {
    %c0_i32 = arith.constant 0 : i32
    %c0_i32_0 = arith.constant 0 : i32
    %c0_i32_1 = arith.constant 0 : i32
    %c0_i32_2 = arith.constant 0 : i32
    return %c0_i32, %c0_i32_0, %c0_i32_1 : i32, i32, i32
  }
  func.func @transform_8(%arg0: i32) -> (i32, i32) {
    %c0_i32 = arith.constant 0 : i32
    %c0_i32_0 = arith.constant 0 : i32
    %c0_i32_1 = arith.constant 0 : i32
    return %c0_i32, %c0_i32_0 : i32, i32
  }
  func.func @transform_9(%arg0: i32) -> (i32, i32) {
    %c0_i32 = arith.constant 0 : i32
    %c0_i32_0 = arith.constant 0 : i32
    %c0_i32_1 = arith.constant 0 : i32
    return %c0_i32, %c0_i32_0 : i32, i32
  }
  func.func @transform_10(%arg0: i32) -> (i32, i32, i32) {
    %c0_i32 = arith.constant 0 : i32
    %c0_i32_0 = arith.constant 0 : i32
    %c0_i32_1 = arith.constant 0 : i32
    return %arg0, %c0_i32, %c0_i32_0 : i32, i32, i32
  }
}

</mosaic_0001>

<bundles_post_ra>
// kernel: _lambda_.1
= control target key start
LH: loop header
LB: loop body
LE: loop exit
PB: predicated region body
PF: predicated region fallthrough
CT: control target
= control target key end

     0   :  { %s1626_s13 = smov 0   ;;  %s1855_s0 = inlined_call_operand.vmem [shape: bf16[2,3,64,8], index: 0, kind: input, shape index: {}]   ;;  %s1856_s1 = inlined_call_operand.vmem [shape: bf16[2,3,36,64], index: 1, kind: input, shape index: {}]   ;;  %s1857_s2 = inlined_call_operand.vmem [shape: f32[72,32], index: 2, kind: input, shape index: {}]   ;;  %s1858_s3 = inlined_call_operand.vmem [shape: f32[1,32], index: 3, kind: input, shape index: {}]   ;;  %s1859_s4 = inlined_call_operand.vmem [shape: f32[1,32], index: 4, kind: input, shape index: {}]   ;;  %s1860_s5 = inlined_call_operand.vmem [shape: f32[1,32], index: 5, kind: input, shape index: {}]   ;;  %s1861_s6 = inlined_call_operand.vmem [shape: f32[3,1,32], index: 6, kind: input, shape index: {}]   ;;  %s1862_s7 = inlined_call_operand.vmem [shape: f32[3,1,32], index: 7, kind: input, shape index: {}]   ;;  %s1863_s8 = inlined_call_operand.vmem [shape: f32[32,128], index: 8, kind: input, shape index: {}]   ;;  %s1864_s9 = inlined_call_operand.vmem [shape: f32[1,128], index: 9, kind: input, shape index: {}]   ;;  %s1865_s10 = inlined_call_operand.vmem [shape: f32[2,8,128], index: 10, kind: output, shape index: {}]  }
   0x1 LB: > { %s1291_s14 = sadd.s32 4294967295, %s1558_s13   ;;  %p1295_p0 = scmp.ge.s32.totalorder %s1558_s13, 1  ;;  %s1558_s13 = sphi %s1626_s13, %s20_s13  }
   0x2   : > { %p322_p1 = scmp.lt.s32.totalorder %s1558_s13, 3 }
   0x4   : > { %p323_p2 = pnand %p1295_p0, %p322_p1 }
   0x5   : > { %p364_p3 = scmp.lt.s32.totalorder (!%p323_p2), %s1291_s14, 1  ;;  %s1562_s23 = smov (!%p323_p2), 8  }
   0x6   : > { %326 = sbr.rel (%p323_p2) target bundleno = 1699 (0x6a3), region = 60  ;;  %s1563_s24 = smov (!%p323_p2), 16  }
   0x7   : > { %s1564_s25 = smov (!%p323_p2), 24   ;;  %s1565_s26 = smov (!%p323_p2), 32  }
   0x8   : > { %s1566_s27 = smov (!%p323_p2), 40   ;;  %s1567_s12 = smov (!%p323_p2), 48  }
   0x9   : > { %s1569_s20 = smov (!%p323_p2), 64  }
   0xb   : > { %v1560_v0 = vmov 0.0   ;;  %s1867_s14 = smov (!%p364_p3, %s1291_s14), 1  ;;  %vm1561_vm0 = vmmov 0   ;;  %vm429_vm1 = vcmask 523264   ;;  %vm495_vm2 = vcmask 60416   ;;  %v862_v40 = vld [vmem:[%s1857_s2 + $0x40] sm:$0xff] }
   0xc   : > { %1410 = vmatprep.subr.bf16.mxu0 %v1560_v0  ;;  %1430 = vmatprep.subr.bf16.mxu1 %v1560_v0  ;;  %s1502_s15 = smul.u32 96, %s1867_s14  ;;  %v861_v44 = vld [vmem:[%s1857_s2 + $0x38] sm:$0xff]  ;;  %v860_v49 = vld [vmem:[%s1857_s2 + $0x30] sm:$0xff]  ;;  %v859_v50 = vld [vmem:[%s1857_s2 + $0x28] sm:$0xff]  ;;  %vm501_vm3 = vcmask 130116   ;;  %vm507_vm4 = vcmask 191616  }
   0xd   : > { %1418 = vmatprep.mubr.msk.bf16.mxu0 %vm1561_vm0, %v1560_v0  ;;  %1438 = vmatprep.mubr.msk.bf16.mxu1 %vm1561_vm0, %v1560_v0  ;;  %s1503_s19 = smul.u32 60, %s1867_s14  ;;  %v858_v53 = vld [vmem:[%s1857_s2 + $0x20] sm:$0xff]  ;;  %v857_v56 = vld [vmem:[%s1857_s2 + $0x18] sm:$0xff]  ;;  %v856_v57 = vld [vmem:[%s1857_s2 + $0x10] sm:$0xff]  ;;  %vm512_vm5 = vcmask 261316   ;;  %vm518_vm6 = vcmask 322816  }
   0xe   : > { %s1646_s18 = scalar_lea.vmem %s1855_s0, %s1502_s15  ;;  %s1568_s15 = smov 56   ;;  %v855_v60 = vld [vmem:[%s1857_s2 + $0x8] sm:$0xff]  ;;  %v854_v62 = vld [vmem:[%s1857_s2] sm:$0xff]  ;;  %vm523_vm7 = vcmask 392516   ;;  %vm529_vm8 = vcmask 454016   ;;  %vm534_vm9 = vcmask 523716  }
   0xf   : > { %v1525_v1 = vld [vmem:[%s1646_s18 + $0x18] sm:$0xff]   ;;  %v1527_v3 = vld [vmem:[%s1646_s18 + $0x10] sm:$0xff]   ;;  %v1529_v5 = vld [vmem:[%s1646_s18 + $0x8] sm:$0xff]   ;;  %s1661_s22 = scalar_lea.vmem %s1856_s1, %s1503_s19  ;;  %vm540_vm10 = vcmask 585216   ;;  %vm870_vm11 = vcmask 588800   ;;  %vm956_vm12 = vcmask 257024  }
  0x10   : > { %v1526_v2 = vld [vmem:[%s1646_s18 + $0x38] sm:$0xff]   ;;  %1411 = vmatpush3.bf16.msra.mxu0 %v1525_v1  ;;  %v1528_v4 = vld [vmem:[%s1646_s18 + $0x30] sm:$0xff]   ;;  %v1530_v6 = vld [vmem:[%s1646_s18 + $0x28] sm:$0xff]   ;;  %vm952_vm13 = vcmask 261120   ;;  %vm1007_vm14 = vcmask 261124   ;;  %s1298_s28 = sshll.u32 %s1867_s14, 3 }
  0x11   : > { %1431 = vmatpush3.bf16.msra.mxu1 %v1526_v2  ;;  %1412 = vmatprep.subr.bf16.mxu0 %v1560_v0  ;;  %v1531_v7 = vld [vmem:[%s1646_s18] sm:$0xff]   ;;  %v1534_v10 = vld [vmem:[%s1661_s22 + $0x14] sm:$0xff]   ;;  %v1536_v13 = vld [vmem:[%s1661_s22 + $0x8] sm:$0xff]   ;;  %s377_s11 = scalar_lea.vmem %s1865_s10, %s1298_s28 }
  0x12   : > { %1432 = vmatprep.subr.bf16.mxu1 %v1560_v0  ;;  %v1532_v8 = vld [vmem:[%s1646_s18 + $0x20] sm:$0xff]   ;;  %v1535_v11 = vld [vmem:[%s1646_s18 + $0x58] sm:$0xff]   ;;  %v1538_v12 = vld [vmem:[%s1646_s18 + $0x50] sm:$0xff]  }
  0x13   : > { %v1533_v9 = vld [vmem:[%s1661_s22] sm:$0xff]   ;;  %v1540_v15 = vld [vmem:[%s1646_s18 + $0x48] sm:$0xff]   ;;  %v1539_v17 = vld [vmem:[%s1661_s22 + $0x10] ss:$0 sps:$4 sm:$0x33]  }
  0x14   : > { %1413 = vmatpush3.bf16.msra.mxu0 %v1527_v3  ;;  %v1537_v14 = vld [vmem:[%s1661_s22 + $0x1c] sm:$0xff]   ;;  %v1542_v18 = vld [vmem:[%s1661_s22 + $0x24] ss:$0 sps:$4 sm:$0x33]   ;;  %v1543_v19 = vld [vmem:[%s1661_s22 + $0x28] sm:$0xff]  }
  0x15   : > { %1433 = vmatpush3.bf16.msra.mxu1 %v1528_v4  ;;  %1414 = vmatprep.subr.bf16.mxu0 %v1560_v0  ;;  %v1541_v16 = vld [vmem:[%s1646_s18 + $0x40] sm:$0xff]   ;;  %v1544_v20 = vld [vmem:[%s1661_s22 + $0x30] sm:$0xff]   ;;  %v1545_v21 = vld [vmem:[%s1661_s22 + $0x38] ss:$0 sps:$4 sm:$0x33]  }
  0x16   : > { %1434 = vmatprep.subr.bf16.mxu1 %v1560_v0 }
  0x18   : > { %1415 = vmatpush3.bf16.msra.mxu0 %v1529_v5 }
  0x19   : > { %1435 = vmatpush3.bf16.msra.mxu1 %v1530_v6  ;;  %1416 = vmatprep.subr.bf16.mxu0 %v1560_v0 }
  0x1a   : > { %1436 = vmatprep.subr.bf16.mxu1 %v1560_v0 }
  0x1c   : > { %1417 = vmatpush3.bf16.msra.mxu0 %v1531_v7 }
  0x1d   : > { %1437 = vmatpush3.bf16.msra.mxu1 %v1532_v8  ;;  %1450 = vmatprep.subr.bf16.mxu0 %v1560_v0 }
  0x1e   : > { %1470 = vmatprep.subr.mxu1 %v862_v40 }
  0x1f   : > { %1419 = vmatmul.mubr.msk.bf16.vlgmr.msra.gmra.mxu0 %vm429_vm1, %v1533_v9 }
  0x20   : > { %1439 = vmatmul.mubr.msk.bf16.vlgmr.msra.gmra.mxu1 %vm429_vm1, %v1534_v10  ;;  %1422 = vmatprep.mubr.msk.bf16.mxu0 %vm1561_vm0, %v1560_v0 }
  0x21   : > { %1451 = vmatpush3.bf16.msra.mxu0 %v1535_v11  ;;  %1442 = vmatprep.mubr.msk.bf16.mxu1 %vm1561_vm0, %v1560_v0 }
  0x22   : > { %1452 = vmatprep.subr.bf16.mxu0 %v1560_v0  ;;  %1471 = vmatpush3.msra.mxu1 %v862_v40 }
  0x23   : > { %1472 = vmatprep.subr.mxu1 %v861_v44 }
  0x24   : > { %1473 = vmatpush3.msra.mxu1 %v861_v44 }
  0x25   : > { %1453 = vmatpush3.bf16.msra.mxu0 %v1538_v12  ;;  %1474 = vmatprep.subr.mxu1 %v860_v49 }
  0x26   : > { %1454 = vmatprep.subr.bf16.mxu0 %v1560_v0  ;;  %1475 = vmatpush3.msra.mxu1 %v860_v49 }
  0x27   : > { %1423 = vmatmul.mubr.msk.bf16.gmra.mxu0 %vm429_vm1, %v1536_v13  ;;  %1476 = vmatprep.subr.mxu1 %v859_v50 }
  0x28   : > { %1443 = vmatmul.mubr.msk.bf16.gmra.mxu1 %vm429_vm1, %v1537_v14  ;;  %1426 = vmatprep.mubr.msk.bf16.mxu0 %vm1561_vm0, %v1560_v0 }
  0x29   : > { %1455 = vmatpush3.bf16.msra.mxu0 %v1540_v15  ;;  %1446 = vmatprep.mubr.msk.bf16.mxu1 %vm1561_vm0, %v1560_v0 }
  0x2a   : > { %1456 = vmatprep.subr.bf16.mxu0 %v1560_v0  ;;  %1477 = vmatpush3.msra.mxu1 %v859_v50 }
  0x2b   : > { %1478 = vmatprep.subr.mxu1 %v858_v53 }
  0x2c   : > { %1479 = vmatpush3.msra.mxu1 %v858_v53 }
  0x2d   : > { %1457 = vmatpush3.bf16.msra.mxu0 %v1541_v16  ;;  %1480 = vmatprep.subr.mxu1 %v857_v56 }
  0x2e   : > { %1481 = vmatpush3.msra.mxu1 %v857_v56  ;;  %v1359_v56 = vld [vmem:[%s1860_s5] ss:$0 sm:$0xff] }
  0x2f   : > { %1427 = vmatmul.mubr.msk.bf16.gmra.mxu0 %vm429_vm1, %v1539_v17  ;;  %1482 = vmatprep.subr.mxu1 %v856_v57 }
  0x30   : > { %1458 = vmatprep.mubr.msk.bf16.mxu0 %vm1561_vm0, %v1560_v0  ;;  %1447 = vmatmul.mubr.msk.bf16.gmra.mxu1 %vm429_vm1, %v1542_v18 }
  0x31   : > { %1483 = vmatpush3.msra.mxu1 %v856_v57 }
  0x32   : > { %1484 = vmatprep.subr.mxu1 %v855_v60 }
  0x33   : > { %1485 = vmatpush3.msra.mxu1 %v855_v60 }
  0x34   : > { %1486 = vmatprep.subr.mxu1 %v854_v62 }
  0x35   : > { %1487 = vmatpush3.msra.mxu1 %v854_v62 }
  0x36   : > { %1491 = vmatprep.subr.mxu1 %v1560_v0 }
  0x37   : > { %1459 = vmatmul.mubr.msk.bf16.vlgmr.msra.gmra.mxu0 %vm429_vm1, %v1543_v19 }
  0x38   : > { %1462 = vmatprep.mubr.msk.bf16.mxu0 %vm1561_vm0, %v1560_v0 }
  0x3f   : > { %1463 = vmatmul.mubr.msk.bf16.gmra.mxu0 %vm429_vm1, %v1544_v20 }
  0x40   : > { %1466 = vmatprep.mubr.msk.bf16.mxu0 %vm1561_vm0, %v1560_v0 }
  0x47   : > { %1467 = vmatmul.mubr.msk.bf16.gmra.mxu0 %vm429_vm1, %v1545_v21 }
  0xdf   : > { %v473_v22 = vpop.f32.mrf.mxu0 }
  0xe0   : > { %496 = vst.msk [vmem:[#allocation2] sm:$0xf] %vm495_vm2, %v473_v22  ;;  %v637_v23 = vpop.f32.mrf.mxu1  ;;  %498 = vrot.lane.b32.xlu0 %v473_v22, %s1562_s23 }
  0xe1   : > { %659 = vst.msk [vmem:[#allocation2 + $0x4] sm:$0xf] %vm495_vm2, %v637_v23  ;;  %v1420_v24 = vpop.f32.mrf.mxu0 }
  0xe2   : > { %v1440_v25 = vpop.f32.mrf.mxu1 }
  0xe3   : > { %v476_v26 = vpop.f32.mrf.mxu0 }
  0xe4   : > { %v640_v27 = vpop.f32.mrf.mxu1  ;;  %661 = vrot.lane.b32.xlu0 %v637_v23, %s1562_s23  ;;  %504 = vrot.lane.b32.xlu1 %v476_v26, %s1563_s24 }
  0xe5   : > { %v1421_v28 = vpop.f32.mrf.mxu0 }
  0xe6   : > { %v1441_v29 = vpop.f32.mrf.mxu1 }
  0xe7   : > { %v481_v30 = vpop.f32.mrf.mxu0 }
  0xe8   : > { %670 = vrot.lane.b32.xlu0 %v640_v27, %s1564_s25  ;;  %666 = vrot.lane.b32.xlu1 %v640_v27, %s1563_s24  ;;  %v645_v31 = vpop.f32.mrf.mxu1 }
  0xe9   : > { %v1424_v32 = vpop.f32.mrf.mxu0 }
  0xea   : > { %v1444_v33 = vpop.f32.mrf.mxu1 }
  0xeb   : > { %v484_v34 = vpop.f32.mrf.mxu0 }
  0xec   : > { %509 = vrot.lane.b32.xlu1 %v476_v26, %s1564_s25  ;;  %515 = vrot.lane.b32.xlu0 %v481_v30, %s1565_s26  ;;  %v648_v35 = vpop.f32.mrf.mxu1 }
  0xed   : > { %v1425_v36 = vpop.f32.mrf.mxu0 }
  0xee   : > { %v1445_v37 = vpop.f32.mrf.mxu1 }
  0xef   : > { %v489_v38 = vpop.f32.mrf.mxu0 }
  0xf0   : > { %675 = vrot.lane.b32.xlu1 %v645_v31, %s1565_s26  ;;  %679 = vrot.lane.b32.xlu0 %v645_v31, %s1566_s27  ;;  %v653_v39 = vpop.f32.mrf.mxu1 }
  0xf1   : > { %v1428_v41 = vpop.f32.mrf.mxu0 }
  0xf2   : > { %v1448_v42 = vpop.f32.mrf.mxu1 }
  0xf3   : > { %v492_v43 = vpop.f32.mrf.mxu0 }
  0xf4   : > { %520 = vrot.lane.b32.xlu1 %v481_v30, %s1566_s27  ;;  %526 = vrot.lane.b32.xlu0 %v484_v34, %s1567_s12  ;;  %v656_v45 = vpop.f32.mrf.mxu1  ;;  %v1355_v30 = vld [vmem:[%s1858_s3] ss:$0 sm:$0xff] }
  0xf5   : > { %v1429_v46 = vpop.f32.mrf.mxu0 }
  0xf6   : > { %v1449_v47 = vpop.f32.mrf.mxu1 }
  0xf7   : > { %v792_v48 = vpop.f32.mrf.mxu0 }
  0xf8   : > { %684 = vrot.lane.b32.xlu1 %v648_v35, %s1567_s12  ;;  %688 = vrot.lane.b32.xlu0 %v648_v35, %s1568_s15  ;;  %814 = vst.msk [vmem:[#allocation2 + $0x8] sm:$0xf] %vm495_vm2, %v792_v48 }
  0xf9   : > { %v1460_v51 = vpop.f32.mrf.mxu0 }
  0xfb   : > { %v795_v52 = vpop.f32.mrf.mxu0 }
  0xfc   : > { %531 = vrot.lane.b32.xlu1 %v484_v34, %s1568_s15  ;;  %537 = vrot.lane.b32.xlu0 %v489_v38, %s1569_s20 }
  0xfd   : > { %v1461_v54 = vpop.f32.mrf.mxu0 }
  0xfe   : > { %v1358_v54 = vld [vmem:[%s1859_s4] ss:$0 sm:$0xff] }
  0xff   : > { %v800_v55 = vpop.f32.mrf.mxu0 }
 0x100   : > { %693 = vrot.lane.b32.xlu1 %v653_v39, %s1569_s20  ;;  %816 = vrot.lane.b32.xlu0 %v792_v48, %s1562_s23 }
 0x101   : > { %v1464_v58 = vpop.f32.mrf.mxu0 }
 0x103   : > { %v803_v59 = vpop.f32.mrf.mxu0 }
 0x104   : > { %825 = vrot.lane.b32.xlu0 %v795_v52, %s1564_s25  ;;  %821 = vrot.lane.b32.xlu1 %v795_v52, %s1563_s24 }
 0x105   : > { %v1465_v61 = vpop.f32.mrf.mxu0 }
 0x107   : > { %v808_v63 = vpop.f32.mrf.mxu0 }
 0x108   : > { %834 = vrot.lane.b32.xlu0 %v800_v55, %s1566_s27  ;;  %830 = vrot.lane.b32.xlu1 %v800_v55, %s1565_s26 }
 0x109   : > { %v1468_v1 = vpop.f32.mrf.mxu0 }
 0x10b   : > { %v811_v2 = vpop.f32.mrf.mxu0 }
 0x10c   : > { %843 = vrot.lane.b32.xlu0 %v803_v59, %s1568_s15  ;;  %839 = vrot.lane.b32.xlu1 %v803_v59, %s1567_s12 }
 0x10d   : > { %v1469_v3 = vpop.f32.mrf.mxu0 }
 0x110   : > { %848 = vrot.lane.b32.xlu1 %v808_v63, %s1569_s20 }
 0x152   : > { %v499_v4 = vpop.permute.xlu0 %498 }
 0x153   : > { %502 = vst.msk [vmem:[#allocation2 - $0x4] sm:$0xf0] %vm501_vm3, %v499_v4 }
 0x156   : > { %v662_v5 = vpop.permute.xlu0 %661  ;;  %v505_v6 = vpop.permute.xlu1 %504 }
 0x157   : > { %664 = vst.msk [vmem:[#allocation2] sm:$0xf0] %vm501_vm3, %v662_v5 }
 0x158   : > { %508 = vst.msk [vmem:[#allocation2] sm:$0xf] %vm507_vm4, %v505_v6 }
 0x15a   : > { %v671_v7 = vpop.permute.xlu0 %670  ;;  %v667_v8 = vpop.permute.xlu1 %666 }
 0x15b   : > { %669 = vst.msk [vmem:[#allocation2 + $0x4] sm:$0xf] %vm507_vm4, %v667_v8 }
 0x15c   : > { %673 = vst.msk [vmem:[#allocation2] sm:$0xf0] %vm512_vm5, %v671_v7  ;;  %v1570_v7 = vmov 0  }
 0x15d   : > { %1523 = vset.pattern.permute.xlu0 %v1570_v7  ;;  %1524 = vset.pattern.permute.xlu1 %v1570_v7 }
 0x15e   : > { %v510_v9 = vpop.permute.xlu1 %509  ;;  %v516_v10 = vpop.permute.xlu0 %515 }
 0x15f   : > { %513 = vst.msk [vmem:[#allocation2 - $0x4] sm:$0xf0] %vm512_vm5, %v510_v9 }
 0x160   : > { %519 = vst.msk [vmem:[#allocation2] sm:$0xf] %vm518_vm6, %v516_v10 }
 0x162   : > { %v676_v11 = vpop.permute.xlu1 %675  ;;  %v680_v12 = vpop.permute.xlu0 %679 }
 0x163   : > { %678 = vst.msk [vmem:[#allocation2 + $0x4] sm:$0xf] %vm518_vm6, %v676_v11 }
 0x164   : > { %682 = vst.msk [vmem:[#allocation2] sm:$0xf0] %vm523_vm7, %v680_v12 }
 0x166   : > { %v521_v13 = vpop.permute.xlu1 %520  ;;  %v527_v14 = vpop.permute.xlu0 %526 }
 0x167   : > { %524 = vst.msk [vmem:[#allocation2 - $0x4] sm:$0xf0] %vm523_vm7, %v521_v13 }
 0x168   : > { %530 = vst.msk [vmem:[#allocation2] sm:$0xf] %vm529_vm8, %v527_v14 }
 0x16a   : > { %v685_v15 = vpop.permute.xlu1 %684  ;;  %v689_v16 = vpop.permute.xlu0 %688 }
 0x16b   : > { %687 = vst.msk [vmem:[#allocation2 + $0x4] sm:$0xf] %vm529_vm8, %v685_v15 }
 0x16c   : > { %691 = vst.msk [vmem:[#allocation2] sm:$0xf0] %vm534_vm9, %v689_v16 }
 0x16e   : > { %v532_v17 = vpop.permute.xlu1 %531  ;;  %v538_v18 = vpop.permute.xlu0 %537 }
 0x16f   : > { %535 = vst.msk [vmem:[#allocation2 - $0x4] sm:$0xf0] %vm534_vm9, %v532_v17 }
 0x170   : > { %541 = vst.msk [vmem:[#allocation2] sm:$0xf] %vm540_vm10, %v538_v18 }
 0x172   : > { %v694_v19 = vpop.permute.xlu1 %693  ;;  %v817_v20 = vpop.permute.xlu0 %816 }
 0x173   : > { %696 = vst.msk [vmem:[#allocation2 + $0x4] sm:$0xf] %vm540_vm10, %v694_v19 }
 0x174   : > { %819 = vst.msk [vmem:[#allocation2 + $0x4] sm:$0xf0] %vm501_vm3, %v817_v20 }
 0x176   : > { %v826_v21 = vpop.permute.xlu0 %825  ;;  %v822_v22 = vpop.permute.xlu1 %821 }
 0x177   : > { %824 = vst.msk [vmem:[#allocation2 + $0x8] sm:$0xf] %vm507_vm4, %v822_v22 }
 0x178   : > { %828 = vst.msk [vmem:[#allocation2 + $0x4] sm:$0xf0] %vm512_vm5, %v826_v21 }
 0x17a   : > { %v835_v23 = vpop.permute.xlu0 %834  ;;  %v831_v24 = vpop.permute.xlu1 %830  ;;  %v852_v25 = vld [vmem:[#allocation2] sm:$0xff] }
 0x17b   : > { %833 = vst.msk [vmem:[#allocation2 + $0x8] sm:$0xf] %vm518_vm6, %v831_v24  ;;  %1488 = vmatprep.mubr.msk.f32.mxu1 %vm870_vm11, %v852_v25 }
 0x17c   : > { %837 = vst.msk [vmem:[#allocation2 + $0x4] sm:$0xf0] %vm523_vm7, %v835_v23 }
 0x17e   : > { %v844_v26 = vpop.permute.xlu0 %843  ;;  %v840_v27 = vpop.permute.xlu1 %839 }
 0x17f   : > { %842 = vst.msk [vmem:[#allocation2 + $0x8] sm:$0xf] %vm529_vm8, %v840_v27 }
 0x180   : > { %846 = vst.msk [vmem:[#allocation2 + $0x4] sm:$0xf0] %vm534_vm9, %v844_v26 }
 0x182   : > { %v849_v28 = vpop.permute.xlu1 %848 }
 0x183   : > { %851 = vst.msk [vmem:[#allocation2 + $0x8] sm:$0xf] %vm540_vm10, %v849_v28 }
 0x18a   : > { %v853_v29 = vld [vmem:[#allocation2 + $0x8] sm:$0xf] }
 0x18b   : > { %1489 = vmatmul.mubr.msk.f32.vlgmr.msra.gmra.mxu1 %vm870_vm11, %v853_v29 }
 0x18c   : > { %1499 = vmatprep.mubr.msk.f32.mxu1 %vm1561_vm0, %v1560_v0 }
 0x24b   : > { %v1490_v31 = vpop.f32.mrf.mxu1 }
 0x24c   : > { %v949_v32 = vadd.f32 %v1490_v31, %v1355_v30 }
 0x24d   : > { %v943_v33 = vpop.f32.mrf.mxu1 }
 0x24e   : > { %v944_v34 = vadd.f32 %v1355_v30, %v943_v33  ;;  %v957_v35 = vsel %vm956_vm12, %v949_v32, 0.0 }
 0x24f   : > { %958 = vadd.xlane.f32.xlu1 %v957_v35 }
 0x250   : > { %v953_v36 = vsel %vm952_vm13, %v944_v34, 0.0 }
 0x251   : > { %954 = vadd.xlane.f32.xlu0 %v953_v36 }
 0x2d8   : > { %v959_v37 = vpop.xlane.xlu1 %958 }
 0x2d9   : > { %v962_v38 = vmul.f32 0.03125, %v959_v37 }
 0x2da   : > { %v955_v39 = vpop.xlane.xlu0 %954 }
 0x2db   : > { %v961_v40 = vmul.f32 0.03125, %v955_v39  ;;  %v964_v41 = vsub.f32 %v949_v32, %v962_v38 }
 0x2dd   : > { %v963_v42 = vsub.f32 %v944_v34, %v961_v40  ;;  %v966_v45 = vmul.f32 %v964_v41, %v964_v41 }
 0x2df   : > { %v965_v43 = vmul.f32 %v963_v42, %v963_v42  ;;  %v970_v46 = vsel %vm956_vm12, %v966_v45, 0.0  ;;  %v1360_v45 = vld [vmem:[%s1861_s6] ss:$0 sm:$0xff] }
 0x2e1   : > { %v967_v44 = vsel %vm952_vm13, %v965_v43, 0.0  ;;  %v1144_v43 = vld [vmem:[%s1863_s8 + $0x8] sm:$0xff] }
 0x2e2   : > { %968 = vadd.xlane.f32.xlu0 %v967_v44  ;;  %v1143_v44 = vld [vmem:[%s1863_s8] sm:$0xff] }
 0x2e6   : > { %971 = vadd.xlane.f32.xlu0 %v970_v46  ;;  %v1367_v46 = vld [vmem:[%s1861_s6 + $0x2] ss:$0 sm:$0xff] }
 0x36b   : > { %v969_v47 = vpop.xlane.xlu0 %968 }
 0x36c   : > { %v973_v48 = vmul.f32 0.03125, %v969_v47 }
 0x36e   : > { %v975_v49 = vadd.f32 1e-05, %v973_v48 }
 0x36f   : > { %v972_v50 = vpop.xlane.xlu0 %971 }
 0x370   : > { %1546 = vrsqrt.f32 %v975_v49  ;;  %v974_v51 = vmul.f32 0.03125, %v972_v50 }
 0x372   : > { %v976_v52 = vadd.f32 1e-05, %v974_v51  ;;  %v1361_v51 = vld [vmem:[%s1862_s7] ss:$0 sm:$0xff] }
 0x374   : > { %1548 = vrsqrt.f32 %v976_v52  ;;  %v1369_v52 = vld [vmem:[%s1862_s7 + $0x2] ss:$0 sm:$0xff] }
 0x37d   : > { %v1547_v53 = vpop.eup %1546 }
 0x37e   : > { %v979_v55 = vmul.f32 %v1547_v53, %v963_v42  ;;  %v1145_v42 = vld [vmem:[%s1863_s8 + $0x10] sm:$0xff] }
 0x380   : > { %v988_v57 = vmul.f32 %v1358_v54, %v979_v55 }
 0x381   : > { %v1549_v58 = vpop.eup %1548 }
 0x382   : > { %v997_v59 = vadd.f32 %v1359_v56, %v988_v57  ;;  %v980_v60 = vmul.f32 %v1549_v58, %v964_v41  ;;  %v1146_v41 = vld [vmem:[%s1863_s8 + $0x18] sm:$0xff] }
 0x383   : > { %1492 = vmatpush3.msra.mxu1 %v1146_v41 }
 0x384   : > { %v999_v61 = vmax.f32 %v997_v59, 0.0  ;;  %v989_v62 = vmul.f32 %v1358_v54, %v980_v60  ;;  %1493 = vmatprep.subr.mxu1 %v1560_v0 }
 0x385   : > { %1494 = vmatpush3.msra.mxu1 %v1145_v42 }
 0x386   : > { %v1001_v63 = vadd.f32 %v999_v61, %v999_v61  ;;  %v998_v1 = vadd.f32 %v1359_v56, %v989_v62  ;;  %1495 = vmatprep.subr.mxu1 %v1560_v0  ;;  %v1365_v56 = vld [vmem:[%s1862_s7 + $0x1] ss:$0 sm:$0xff] }
 0x387   : > { %1496 = vmatpush3.msra.mxu1 %v1144_v43 }
 0x388   : > { %v1008_v2 = vsel %vm1007_vm14, %v1001_v63, 0.0  ;;  %v1003_v3 = vsel %vm956_vm12, %v1001_v63, 0.0  ;;  %v1000_v4 = vmax.f32 %v998_v1, 0.0  ;;  %1497 = vmatprep.subr.mxu1 %v1560_v0  ;;  %v1363_v0 = vld [vmem:[%s1861_s6 + $0x1] ss:$0 sm:$0xff] }
 0x389   : > { %1009 = vadd.xlane.f32.xlu1 %v1008_v2  ;;  %1004 = vadd.xlane.f32.xlu0 %v1003_v3 }
 0x38a   : > { %v1002_v5 = vadd.f32 %v1000_v4, %v1000_v4  ;;  %1498 = vmatpush3.msra.mxu1 %v1143_v44 }
 0x38c   : > { %v1012_v6 = vsel %vm956_vm12, %v1002_v5, 0.0 }
 0x38d   : > { %1013 = vadd.xlane.f32.xlu1 %v1012_v6 }
 0x412   : > { %v1010_v8 = vpop.xlane.xlu1 %1009  ;;  %v1005_v9 = vpop.xlane.xlu0 %1004 }
 0x413   : > { %v1011_v10 = vmul.f32 0.03125, %v1010_v8  ;;  %v1006_v12 = vmul.f32 0.03125, %v1005_v9 }
 0x415   : > { %v1017_v11 = vrot.slane %v1011_v10, 4 }
 0x416   : > { %v1014_v13 = vpop.xlane.xlu1 %1013 }
 0x417   : > { %v1019_v14 = vadd.f32 %v1017_v11, %v1006_v12  ;;  %v1015_v15 = vmul.f32 0.03125, %v1014_v13 }
 0x419   : > { %v1020_v16 = vadd.f32 %v1019_v14, %v1015_v15 }
 0x41b   : > { %v1021_v17 = vmul.f32 0.33333334, %v1020_v16 }
 0x41d   : > { %1024 = vperm.xlu0 %1523, %v1021_v17  }
 0x498   : > { %v1025_v18 = vpop.permute.xlu0 %1024 }
 0x499   : > { %v1027_v19 = vsub.f32 %v1001_v63, %v1025_v18  ;;  %v1028_v20 = vrot.slane %v1025_v18, 4  ;;  %v1031_v23 = vsub.f32 %v1002_v5, %v1025_v18 }
 0x49b   : > { %v1030_v21 = vsub.f32 %v1001_v63, %v1028_v20  ;;  %v1032_v22 = vmul.f32 %v1027_v19, %v1027_v19  ;;  %v1042_v27 = vmul.f32 %v1031_v23, %v1031_v23 }
 0x49d   : > { %v1033_v24 = vsel %vm956_vm12, %v1032_v22, 0.0  ;;  %v1037_v25 = vmul.f32 %v1030_v21, %v1030_v21  ;;  %v1043_v28 = vsel %vm956_vm12, %v1042_v27, 0.0 }
 0x49e   : > { %1034 = vadd.xlane.f32.xlu1 %v1033_v24  ;;  %v1221_v24 = vlaneseq }
 0x49f   : > { %v1038_v26 = vsel %vm1007_vm14, %v1037_v25, 0.0 }
 0x4a0   : > { %v1222_v25 = vshrl.u32 %v1221_v24, 7 }
 0x4a2   : > { %1039 = vadd.xlane.f32.xlu1 %v1038_v26  ;;  %v1147_v26 = vld [vmem:[%s1864_s9] sm:$0x1]  ;;  %v1223_v27 = vsub.s32 0, %v1222_v25 }
 0x4a6   : > { %1044 = vadd.xlane.f32.xlu1 %v1043_v28 }
 0x527   : > { %v1035_v29 = vpop.xlane.xlu1 %1034 }
 0x528   : > { %v1036_v32 = vmul.f32 0.03125, %v1035_v29 }
 0x52b   : > { %v1040_v30 = vpop.xlane.xlu1 %1039 }
 0x52c   : > { %v1041_v31 = vmul.f32 0.03125, %v1040_v30 }
 0x52e   : > { %v1048_v33 = vrot.slane %v1041_v31, 4 }
 0x52f   : > { %v1045_v34 = vpop.xlane.xlu1 %1044 }
 0x530   : > { %v1050_v35 = vadd.f32 %v1048_v33, %v1036_v32  ;;  %v1046_v36 = vmul.f32 0.03125, %v1045_v34 }
 0x532   : > { %v1051_v37 = vadd.f32 %v1050_v35, %v1046_v36 }
 0x534   : > { %v1052_v38 = vmul.f32 0.33333334, %v1051_v37 }
 0x536   : > { %v1053_v39 = vadd.f32 1e-05, %v1052_v38 }
 0x538   : > { %1550 = vrsqrt.f32 %v1053_v39 }
 0x545   : > { %v1551_v40 = vpop.eup %1550 }
 0x546   : > { %1057 = vperm.xlu1 %1524, %v1551_v40  }
 0x5c1   : > { %v1058_v47 = vpop.permute.xlu1 %1057 }
 0x5c2   : > { %v1060_v48 = vmul.f32 %v1058_v47, %v1027_v19  ;;  %v1085_v49 = vrot.slane %v1058_v47, 4  ;;  %v1115_v50 = vmul.f32 %v1058_v47, %v1031_v23 }
 0x5c4   : > { %v1068_v53 = vmul.f32 %v1360_v45, %v1060_v48  ;;  %v1087_v54 = vmul.f32 %v1085_v49, %v1030_v21  ;;  %v1124_v55 = vmul.f32 %v1367_v46, %v1115_v50 }
 0x5c6   : > { %v1076_v57 = vadd.f32 %v1361_v51, %v1068_v53  ;;  %v1096_v58 = vmul.f32 %v1363_v0, %v1087_v54  ;;  %v1133_v59 = vadd.f32 %v1369_v52, %v1124_v55 }
 0x5c8   : > { %v1077_v60 = vmax.f32 %v1076_v57, 0.0  ;;  %v1105_v61 = vadd.f32 %v1365_v56, %v1096_v58  ;;  %v1134_v62 = vmax.f32 %v1133_v59, 0.0 }
 0x5ca   : > { %v1078_v63 = vsel %vm956_vm12, %v1077_v60, -inf  ;;  %v1106_v1 = vmax.f32 %v1105_v61, 0.0  ;;  %v1135_v2 = vsel %vm956_vm12, %v1134_v62, -inf }
 0x5cb   : > { %v1079_v3 = vrot.slane %v1078_v63, 4  ;;  %v1136_v4 = vrot.slane %v1135_v2, 4 }
 0x5cc   : > { %v1107_v5 = vsel %vm1007_vm14, %v1106_v1, -inf }
 0x5cd   : > { %v1080_v6 = vmax.f32 %v1078_v63, %v1079_v3  ;;  %v1108_v7 = vrot.slane %v1107_v5, 4  ;;  %v1137_v8 = vmax.f32 %v1135_v2, %v1136_v4 }
 0x5cf   : > { %v1081_v9 = vrot.slane %v1080_v6, 2  ;;  %v1109_v10 = vmax.f32 %v1107_v5, %v1108_v7  ;;  %v1138_v11 = vrot.slane %v1137_v8, 2 }
 0x5d1   : > { %v1082_v12 = vmax.f32 %v1080_v6, %v1081_v9  ;;  %v1110_v13 = vrot.slane %v1109_v10, 2  ;;  %v1139_v14 = vmax.f32 %v1137_v8, %v1138_v11 }
 0x5d3   : > { %v1083_v15 = vrot.slane %v1082_v12, 1  ;;  %v1111_v16 = vmax.f32 %v1109_v10, %v1110_v13  ;;  %v1140_v18 = vrot.slane %v1139_v14, 1 }
 0x5d5   : > { %v1112_v17 = vrot.slane %v1111_v16, 1  ;;  %v1084_v19 = vmax.f32 %v1082_v12, %v1083_v15  ;;  %v1141_v21 = vmax.f32 %v1139_v14, %v1140_v18 }
 0x5d7   : > { %v1113_v20 = vmax.f32 %v1111_v16, %v1112_v17 }
 0x5d9   : > { %v1114_v22 = vadd.f32 %v1113_v20, %v1084_v19 }
 0x5db   : > { %v1142_v23 = vadd.f32 %v1141_v21, %v1114_v22 }
 0x5dd   : > { %1500 = vmatmul.mubr.msk.f32.vlgmr.msra.gmra.mxu1 %vm952_vm13, %v1142_v23 }
 0x69d   : > { %v1217_v28 = vpop.f32.mrf.mxu1 }
 0x69e   : > { %v1218_v29 = vadd.f32 %v1217_v28, %v1147_v26 }
 0x69f   : > { %v1501_v30 = vpop.f32.mrf.mxu1 }
 0x6a0   : > { %v1224_v31 = vrot.slane %v1218_v29, %v1223_v27 }
 0x6a2   : > { %1225 = vst [vmem:[%s377_s11] sm:$0xff] %v1224_v31 }
 0x6a3 PF: > { %s20_s13 = sadd.s32 1, %s1558_s13  }
 0x6a4   : > { %p17_p4 = scmp.ge.s32.totalorder %s20_s13, 4  }
 0x6a6   :  { %19 = sbr.rel (!%p17_p4) target bundleno = 1 (0x1), region = 101 }

</bundles_post_ra>
